<compile_context>
chip_gen: v5e
topology: v5e:2x2
jax: 0.10.0
libtpu: 0.0.40
codegen_flags: <defaults>
</compile_context>

<pallas_src>
import math
import functools

import numpy as np
import jax
import jax.numpy as jnp
from jax.experimental import pallas as pl
from jax.experimental.pallas import tpu as pltpu

NODE_FEAT_IN = 37
NODE_HIDDEN = 128
FC_HIDDEN = 128
TRANS_HIDDEN = 128
NUM_HEADS = 8
N_CONV_LAYERS = 4
N_FC_LAYERS = 1
GMT_NUM_NODES = 300            # PyG GraphMultisetTransformer default num_nodes
GMT_POOL_RATIO = 0.25          # default pooling_ratio
NUM_SEEDS_POOL1 = math.ceil(GMT_NUM_NODES * GMT_POOL_RATIO)   # 75 seeds (GMPool_G)
NUM_SEEDS_POOL3 = 1            # last pool reduces to a single vector

# With bf16 A_hat + Buffered(1) constant-index inputs, the fused kernel's
# footprint at Np=2048 is ~13.5 MiB: fits v5e (16 MiB scoped default, limit
# raised explicitly below), v6e and v7x (64 MiB physical VMEM).
# TODO(synk): on v7x, benchmark the tiled ("parallel" row-tile, 2-core) path
# against the fused single-core path near this threshold and lower if needed.
FUSE_MAX_NODES = 2048
RESIDENT_RHS_MAX_BYTES = 4 * 1024 * 1024
MXU_DTYPE = jnp.bfloat16


def _round_up(v, m):
    return ((v + m - 1) // m) * m


# --------------------------------------------------------------------------
# Generic tiled matmul:  y = [relu](A @ B + bias)
#   * single reduction step -> direct kernel, no accumulator scratch
#   * multiple reduction steps -> VMEM accumulator, optionally VMEM-resident
#     full-K RHS (constant block index, single-buffered) sliced per k-step
# --------------------------------------------------------------------------
def _matmul_kernel_single(a_ref, b_ref, bias_ref, o_ref, *, relu):
    y = jnp.dot(a_ref[...], b_ref[...],
                preferred_element_type=jnp.float32) + bias_ref[...]
    if relu:
        y = jnp.maximum(y, 0.0)
    o_ref[...] = y


def _matmul_kernel_multi(a_ref, b_ref, bias_ref, o_ref, acc_ref, *,
                         relu, tk, rhs_resident):
    k = pl.program_id(1)

    @pl.when(k == 0)
    def _():
        acc_ref[...] = jnp.zeros_like(acc_ref)

    if rhs_resident:
        b = b_ref[pl.ds(pl.multiple_of(k * tk, tk), tk), :]
    else:
        b = b_ref[...]
    acc_ref[...] += jnp.dot(a_ref[...], b, preferred_element_type=jnp.float32)

    @pl.when(k == pl.num_programs(1) - 1)
    def _():
        y = acc_ref[...] + bias_ref[...]
        if relu:
            y = jnp.maximum(y, 0.0)
        o_ref[...] = y


def matmul_bias(a, b, bias=None, relu=False, mxu_dtype=MXU_DTYPE):
    """Tiled y = [relu](a @ b + bias); bf16 MXU operands, f32 accumulation."""
    M, K = a.shape
    K2, N = b.shape
    assert K == K2
    Npad = _round_up(N, 128)
    Kp = _round_up(K, 128)
    # Larger tiles: 512 reaches ~85% of HBM roofline vs ~63% at 256.
    if Kp % 512 == 0:
        tk = 512
    elif Kp % 256 == 0:
        tk = 256
    else:
        tk = 128
    Mp8 = _round_up(M, 8)
    if Mp8 >= 512:
        tm, Mp = 512, _round_up(M, 512)
    elif Mp8 >= 256:
        tm, Mp = 256, _round_up(M, 256)
    else:
        tm, Mp = Mp8, Mp8

    a_c = a.astype(mxu_dtype)
    b_c = b.astype(mxu_dtype)
    a_p = a_c if (Mp, Kp) == (M, K) else \
        jnp.zeros((Mp, Kp), mxu_dtype).at[:M, :K].set(a_c)
    b_p = b_c if (Kp, Npad) == (K, N) else \
        jnp.zeros((Kp, Npad), mxu_dtype).at[:K, :N].set(b_c)
    bias_p = jnp.zeros((1, Npad), jnp.float32)
    if bias is not None:
        bias_p = bias_p.at[0, :N].set(bias.astype(jnp.float32))

    nk = Kp // tk
    if nk == 1:
        out = pl.pallas_call(
            functools.partial(_matmul_kernel_single, relu=relu),
            out_shape=jax.ShapeDtypeStruct((Mp, Npad), jnp.float32),
            grid=(Mp // tm,),
            in_specs=[pl.BlockSpec((tm, Kp), lambda i: (i, 0)),
                      pl.BlockSpec((Kp, Npad), lambda i: (0, 0),
                                   pipeline_mode=pl.Buffered(1)),
                      pl.BlockSpec((1, Npad), lambda i: (0, 0),
                                   pipeline_mode=pl.Buffered(1))],
            out_specs=pl.BlockSpec((tm, Npad), lambda i: (i, 0)),
            compiler_params=pltpu.CompilerParams(
                dimension_semantics=("parallel",)),
        )(a_p, b_p, bias_p)
    else:
        rhs_bytes = Kp * Npad * jnp.dtype(mxu_dtype).itemsize
        rhs_resident = rhs_bytes <= RESIDENT_RHS_MAX_BYTES
        if rhs_resident:
            # Full-K RHS stays in VMEM across all row tiles (no re-streaming).
            b_spec = pl.BlockSpec((Kp, Npad), lambda i, k: (0, 0),
                                  pipeline_mode=pl.Buffered(1))
        else:
            b_spec = pl.BlockSpec((tk, Npad), lambda i, k: (k, 0))
        out = pl.pallas_call(
            functools.partial(_matmul_kernel_multi, relu=relu, tk=tk,
                              rhs_resident=rhs_resident),
            out_shape=jax.ShapeDtypeStruct((Mp, Npad), jnp.float32),
            grid=(Mp // tm, nk),
            in_specs=[pl.BlockSpec((tm, tk), lambda i, k: (i, k)),
                      b_spec,
                      pl.BlockSpec((1, Npad), lambda i, k: (0, 0),
                                   pipeline_mode=pl.Buffered(1))],
            out_specs=pl.BlockSpec((tm, Npad), lambda i, k: (i, 0)),
            scratch_shapes=[pltpu.VMEM((tm, Npad), jnp.float32)],
            compiler_params=pltpu.CompilerParams(
                dimension_semantics=("parallel", "arbitrary")),
        )(a_p, b_p, bias_p)
    if (Mp, Npad) != (M, N):
        out = out[:M, :N]
    return out


# --------------------------------------------------------------------------
# Fused node-level kernel (small/medium graphs): bf16 A_hat stays resident in
# VMEM (single-buffered) while the grid iterates over the conv layers; the
# final step also applies lin1 and the fused (K|V) GCNConv projection.
# --------------------------------------------------------------------------
def _fused_node_kernel(a_ref, x_ref, w_ref, b_ref, wl_ref, bl_ref,
                       wkv_ref, bkv_ref, kv_ref, h_ref, *, n_layers):
    l = pl.program_id(0)

    @pl.when(l == 0)
    def _():
        h_ref[...] = x_ref[...]

    a = a_ref[...]                                   # (Np, Np) bf16
    h = h_ref[...]                                   # (Np, F)  bf16
    xw = jnp.dot(h, w_ref[0], preferred_element_type=jnp.float32)
    y = jnp.dot(a, xw.astype(jnp.bfloat16),
                preferred_element_type=jnp.float32) + b_ref[0]
    y = jnp.maximum(y, 0.0)                          # f32 activations
    h_ref[...] = y.astype(jnp.bfloat16)

    @pl.when(l == n_layers - 1)
    def _():
        yb = y.astype(jnp.bfloat16)
        h1 = jnp.dot(yb, wl_ref[...], preferred_element_type=jnp.float32) + bl_ref[...]
        kv = jnp.dot(h1.astype(jnp.bfloat16), wkv_ref[...],
                     preferred_element_type=jnp.float32)
        kv_ref[...] = jnp.dot(a, kv.astype(jnp.bfloat16),
                              preferred_element_type=jnp.float32) + bkv_ref[...]


def fused_node_stack(a_hat, x, conv_wb, lin1_wb, kv_wb):
    n = x.shape[0]
    kin = x.shape[1]
    F = NODE_HIDDEN
    L = len(conv_wb)
    Np = max(128, _round_up(n, 128))

    a_p = jnp.zeros((Np, Np), jnp.bfloat16).at[:n, :n].set(a_hat.astype(jnp.bfloat16))
    x_p = jnp.zeros((Np, F), jnp.bfloat16).at[:n, :kin].set(x.astype(jnp.bfloat16))

    w_stack = jnp.zeros((L, F, F), jnp.bfloat16)
    b_stack = jnp.zeros((L, 1, F), jnp.float32)
    for l, (w, b) in enumerate(conv_wb):
        w_stack = w_stack.at[l, :w.shape[0], :].set(w.astype(jnp.bfloat16))
        b_stack = b_stack.at[l, 0, :].set(b)
    w_l1, b_l1 = lin1_wb
    w_kv, b_kv = kv_wb

    # Explicit VMEM budget with headroom (v7x physical VMEM is only 64 MiB).
    est = (Np * Np * 2            # A_hat bf16, Buffered(1)
           + 2 * Np * F * 2       # x (Buffered(1)) + h scratch, bf16
           + 2 * Np * 2 * F * 4   # kv output f32, double-buffered
           + 2 * (F * F * 2 + F * 4)          # conv w/b stacks, double-buffered
           + F * F * 2 + F * 2 * F * 2 + 8 * F * 4)
    vmem_limit = int(min(max(2 * est, 32 * 1024 * 1024), 48 * 1024 * 1024))

    out = pl.pallas_call(
        functools.partial(_fused_node_kernel, n_layers=L),
        out_shape=jax.ShapeDtypeStruct((Np, 2 * F), jnp.float32),
        grid=(L,),
        in_specs=[
            pl.BlockSpec((Np, Np), lambda l: (0, 0),
                         pipeline_mode=pl.Buffered(1)),      # A_hat: resident
            pl.BlockSpec((Np, F), lambda l: (0, 0),
                         pipeline_mode=pl.Buffered(1)),
            pl.BlockSpec((1, F, F), lambda l: (l, 0, 0)),
            pl.BlockSpec((1, 1, F), lambda l: (l, 0, 0)),
            pl.BlockSpec((F, F), lambda l: (0, 0),
                         pipeline_mode=pl.Buffered(1)),
            pl.BlockSpec((1, F), lambda l: (0, 0),
                         pipeline_mode=pl.Buffered(1)),
            pl.BlockSpec((F, 2 * F), lambda l: (0, 0),
                         pipeline_mode=pl.Buffered(1)),
            pl.BlockSpec((1, 2 * F), lambda l: (0, 0),
                         pipeline_mode=pl.Buffered(1)),
        ],
        out_specs=pl.BlockSpec((Np, 2 * F), lambda l: (0, 0)),
        scratch_shapes=[pltpu.VMEM((Np, F), jnp.bfloat16)],
        compiler_params=pltpu.CompilerParams(
            dimension_semantics=("arbitrary",),
            vmem_limit_bytes=vmem_limit),
    )(a_p, x_p, w_stack, b_stack,
      w_l1.astype(jnp.bfloat16), b_l1.reshape(1, F).astype(jnp.float32),
      w_kv.astype(jnp.bfloat16), b_kv.reshape(1, 2 * F).astype(jnp.float32))
    return out[:n]                                            # (n, 2F) = [K | V]


# --------------------------------------------------------------------------
# MAB (multi-head attention block) of the GraphMultisetTransformer.
# Lane-dense: D=128 stays on the lane dim end-to-end.  Per-head scores use a
# full-D contraction with head-lane-masked K (same MXU passes as a dh=16
# contraction, no 16-lane slicing), the head merge is a masked full-width
# accumulate, and fc_o + residual + ReLU are one batched epilogue.
# --------------------------------------------------------------------------
def _mab_kernel(q_ref, k_ref, v_ref, m_ref, wo_ref, bo_ref, o_ref, *,
                num_heads, scale):
    q = q_ref[...]                       # (bt, Nq, D) f32
    k = k_ref[...]                       # (bt, Nk, D) f32
    v = v_ref[...]                       # (bt, Nk, D) f32
    m = m_ref[...]                       # (bt, 1, Nk) f32 additive key mask
    bt, Nq, D = q.shape
    dh = D // num_heads

    qb = q.astype(jnp.bfloat16)
    vb = v.astype(jnp.bfloat16)
    lane = jax.lax.broadcasted_iota(jnp.int32, (1, 1, D), 2)

    attn = jnp.zeros((bt, Nq, D), jnp.float32)
    for h in range(num_heads):
        sel = (lane // dh) == h                                     # (1, 1, D)
        kh = jnp.where(sel, k, 0.0).astype(jnp.bfloat16)            # head-masked K
        s = jnp.einsum('bqd,bkd->bqk', qb, kh,
                       preferred_element_type=jnp.float32)          # (bt, Nq, Nk)
        s = s * scale + m
        s = s - jnp.max(s, axis=-1, keepdims=True)
        p = jnp.exp(s)
        p = p / jnp.sum(p, axis=-1, keepdims=True)                  # exact softmax
        pv = jnp.einsum('bqk,bkd->bqd', p.astype(jnp.bfloat16), vb,
                        preferred_element_type=jnp.float32)         # (bt, Nq, D)
        attn = attn + jnp.where(sel, pv, 0.0)                       # merge heads

    og = q + attn                                                   # residual with Q
    wo_b = jnp.broadcast_to(wo_ref[...].astype(jnp.bfloat16)[None], (bt, D, D))
    y = jnp.einsum('bqd,bde->bqe', og.astype(jnp.bfloat16), wo_b,
                   preferred_element_type=jnp.float32) + bo_ref[...]
    o_ref[...] = og + jnp.maximum(y, 0.0)                           # fused fc_o + ReLU


def mab_block(q_full, k_full, v_full, mask_add, fc_o, *, num_heads=NUM_HEADS):
    """Full MAB: out = attn(Q,K,V)+Q ; out = out + relu(fc_o(out))."""
    B, Nq, D = q_full.shape
    Nk = k_full.shape[1]
    scale = 1.0 / math.sqrt(D)            # PyG MAB divides by sqrt(dim_V)
    wo, bo = fc_o

    # Pick bt = largest divisor of B that still leaves >= 2 grid steps so both
    # v7x TensorCores get work; on single-TC v5e/v6e the extra step only costs
    # ~0.35us.  B == 1 falls back to a single step.
    bt = B
    for cand in (8, 4, 2, 1):
        if B % cand == 0 and B // cand >= 2:
            bt = cand
            break

    kern = functools.partial(_mab_kernel, num_heads=num_heads, scale=scale)
    return pl.pallas_call(
        kern,
        out_shape=jax.ShapeDtypeStruct((B, Nq, D), jnp.float32),
        grid=(B // bt,),
        in_specs=[
            pl.BlockSpec((bt, Nq, D), lambda g: (g, 0, 0)),
            pl.BlockSpec((bt, Nk, D), lambda g: (g, 0, 0)),
            pl.BlockSpec((bt, Nk, D), lambda g: (g, 0, 0)),
            pl.BlockSpec((bt, 1, Nk), lambda g: (g, 0, 0)),
            pl.BlockSpec((D, D), lambda g: (0, 0),
                         pipeline_mode=pl.Buffered(1)),
            pl.BlockSpec((1, D), lambda g: (0, 0),
                         pipeline_mode=pl.Buffered(1)),
        ],
        out_specs=pl.BlockSpec((bt, Nq, D), lambda g: (g, 0, 0)),
        compiler_params=pltpu.CompilerParams(
            dimension_semantics=("parallel",)),
    )(q_full, k_full, v_full, mask_add, wo, bo.reshape(1, D))


# --------------------------------------------------------------------------
# Fused last-FC + 128->1 output head (lane-dense padded output).
# --------------------------------------------------------------------------
def _fc_out_kernel(h_ref, wf_ref, bf_ref, wo_ref, bo_ref, o_ref):
    y = jnp.maximum(jnp.dot(h_ref[...], wf_ref[...],
                            preferred_element_type=jnp.float32) + bf_ref[...], 0.0)
    # TODO(synk): Dropout(p=0.2) after the ReLU is treated as eval-mode identity.
    o_ref[...] = jnp.dot(y.astype(jnp.bfloat16), wo_ref[...],
                         preferred_element_type=jnp.float32) + bo_ref[...]


def fc_out_head(h, fc_wb, out_wb):
    B, D = h.shape
    wf, bf = fc_wb
    wo, bo = out_wb                       # (D, 1), (1,)
    F = wf.shape[1]
    OUTP = 128                            # pad the 1-wide head to a lane-dense width
    wo_p = jnp.zeros((F, OUTP), jnp.bfloat16).at[:, :wo.shape[1]].set(wo.astype(jnp.bfloat16))
    bo_p = jnp.zeros((1, OUTP), jnp.float32).at[0, :bo.shape[0]].set(bo)
    Bp = _round_up(B, 8)
    h_b = h.astype(jnp.bfloat16)
    h_p = h_b if Bp == B else jnp.zeros((Bp, D), jnp.bfloat16).at[:B].set(h_b)
    out = pl.pallas_call(
        _fc_out_kernel,
        out_shape=jax.ShapeDtypeStruct((Bp, OUTP), jnp.float32),
        grid=(1,),
        in_specs=[pl.BlockSpec((Bp, D), lambda i: (0, 0)),
                  pl.BlockSpec((D, F), lambda i: (0, 0)),
                  pl.BlockSpec((1, F), lambda i: (0, 0)),
                  pl.BlockSpec((F, OUTP), lambda i: (0, 0)),
                  pl.BlockSpec((1, OUTP), lambda i: (0, 0))],
        out_specs=pl.BlockSpec((Bp, OUTP), lambda i: (0, 0)),
    )(h_p, wf.astype(jnp.bfloat16), bf.reshape(1, F).astype(jnp.float32), wo_p, bo_p)
    return out[:B, :wo.shape[1]]


# ------------------------------- JAX glue ---------------------------------
def gcn_normalized_adj(edge_index, num_nodes):
    src, dst = edge_index[0], edge_index[1]
    a = jnp.zeros((num_nodes, num_nodes), jnp.float32).at[dst, src].add(1.0)
    a = a + jnp.eye(num_nodes, dtype=jnp.float32)        # add_self_loops
    deg = jnp.sum(a, axis=1)
    d_inv_sqrt = jax.lax.rsqrt(deg)
    return a * d_inv_sqrt[:, None] * d_inv_sqrt[None, :]


def to_dense_batch(x, batch, num_graphs, max_nodes):
    # NOTE: assumes `batch` is sorted ascending (PyG convention).
    n = x.shape[0]
    first_idx = jnp.searchsorted(batch, jnp.arange(num_graphs, dtype=batch.dtype))
    pos = jnp.arange(n) - first_idx[batch]
    dense = jnp.zeros((num_graphs, max_nodes, x.shape[1]), x.dtype)
    dense = dense.at[batch, pos].set(x)
    mask = jnp.zeros((num_graphs, max_nodes), bool).at[batch, pos].set(True)
    return dense, mask


def init_params(key):
    it = iter(jax.random.split(key, 40))

    def lin(fin, fout):
        k = next(it)
        w = jax.random.normal(k, (fin, fout), jnp.float32) * (1.0 / math.sqrt(fin))
        b = jnp.zeros((fout,), jnp.float32)
        return (w, b)

    p = {}
    p["conv"] = [lin(NODE_FEAT_IN, NODE_HIDDEN)] + [
        lin(NODE_HIDDEN, NODE_HIDDEN) for _ in range(N_CONV_LAYERS - 1)]
    p["lin1"] = lin(NODE_HIDDEN, TRANS_HIDDEN)
    # pool 1: GMPool_G (PMA with GCNConv key/value projections, 75 seeds)
    p["S1"] = jax.random.normal(next(it), (NUM_SEEDS_POOL1, TRANS_HIDDEN), jnp.float32) * 0.1
    p["q1"], p["k1"], p["v1"], p["o1"] = (lin(TRANS_HIDDEN, TRANS_HIDDEN) for _ in range(4))
    # pool 2: SelfAtt (SAB)
    p["q2"], p["k2"], p["v2"], p["o2"] = (lin(TRANS_HIDDEN, TRANS_HIDDEN) for _ in range(4))
    # pool 3: GMPool_I (PMA, single seed)
    p["S3"] = jax.random.normal(next(it), (NUM_SEEDS_POOL3, TRANS_HIDDEN), jnp.float32) * 0.1
    p["q3"], p["k3"], p["v3"], p["o3"] = (lin(TRANS_HIDDEN, TRANS_HIDDEN) for _ in range(4))
    p["lin2"] = lin(TRANS_HIDDEN, FC_HIDDEN)
    p["fc"] = [lin(FC_HIDDEN, FC_HIDDEN) for _ in range(N_FC_LAYERS)]
    p["out"] = lin(FC_HIDDEN, 1)
    return p


def prepare_params(params):
    """One-time derived params: fused weight concats and pre-projected seeds."""
    p = dict(params)
    p["w_kv1"] = jnp.concatenate([params["k1"][0], params["v1"][0]], axis=1)   # (D, 2D)
    p["b_kv1"] = jnp.concatenate([params["k1"][1], params["v1"][1]], axis=0)   # (2D,)
    p["w_qkv2"] = jnp.concatenate([params["q2"][0], params["k2"][0], params["v2"][0]], axis=1)
    p["b_qkv2"] = jnp.concatenate([params["q2"][1], params["k2"][1], params["v2"][1]], axis=0)
    p["w_kv3"] = jnp.concatenate([params["k3"][0], params["v3"][0]], axis=1)
    p["b_kv3"] = jnp.concatenate([params["k3"][1], params["v3"][1]], axis=0)
    # Seed queries depend only on params: project them once here.
    p["q_seed1"] = params["S1"] @ params["q1"][0] + params["q1"][1]            # (75, D)
    p["q_seed3"] = params["S3"] @ params["q3"][0] + params["q3"][1]            # (1, D)
    return p


def gcn_model_forward(params, x, edge_index, edge_attr, batch, *,
                      num_graphs, max_nodes, use_fused_stack=None):
    del edge_attr  # unused by GCNmodel.forward (matches the PyTorch reference)
    n = x.shape[0]
    x = x.astype(jnp.float32)
    a_hat = gcn_normalized_adj(edge_index, n)
    D = TRANS_HIDDEN

    if use_fused_stack is None:
        use_fused_stack = n <= FUSE_MAX_NODES
    if use_fused_stack:
        # Single kernel: conv stack + lin1 + (K|V) GCNConv, A_hat resident in VMEM.
        kv_nodes = fused_node_stack(a_hat, x, params["conv"], params["lin1"],
                                    (params["w_kv1"], params["b_kv1"]))
    else:
        # Large-graph path: tiled matmuls.  A_hat padded + bf16-cast ONCE.
        n_pad = _round_up(n, 512) if n >= 512 else _round_up(max(n, 8), 8)
        a_p = jnp.zeros((n_pad, n_pad), MXU_DTYPE).at[:n, :n].set(
            a_hat.astype(MXU_DTYPE))
        h = jnp.zeros((n_pad, NODE_FEAT_IN), jnp.float32).at[:n].set(x)
        for (w, b) in params["conv"]:
            xw = matmul_bias(h, w)                            # X @ W
            h = matmul_bias(a_p, xw, b, relu=True)            # A_hat @ XW + b
        h1 = matmul_bias(h, params["lin1"][0], params["lin1"][1])
        kv_nodes = matmul_bias(a_p, matmul_bias(h1, params["w_kv1"]),
                               params["b_kv1"])[:n]

    # ---- GraphMultisetTransformer ----
    B = num_graphs
    Nk = _round_up(max(max_nodes, 8), 8)
    kv_dense, node_mask = to_dense_batch(kv_nodes, batch, B, Nk)   # (B, Nk, 2D)
    K1 = kv_dense[:, :, :D]
    V1 = kv_dense[:, :, D:]
    mask_add = jnp.where(node_mask, 0.0, -1e9).astype(jnp.float32)[:, None, :]  # (B,1,Nk)

    # pool 1: GMPool_G -- PMA with 75 seeds, GCNConv-based K/V projections
    Q = jnp.broadcast_to(params["q_seed1"][None], (B, NUM_SEEDS_POOL1, D))
    batch_x = mab_block(Q, K1, V1, mask_add, params["o1"])                 # (B, 75, D)

    # pool 2: SelfAtt -- SAB over the pooled set (fused QKV projection)
    S = NUM_SEEDS_POOL1
    xf = batch_x.reshape(B * S, D)
    qkv = matmul_bias(xf, params["w_qkv2"], params["b_qkv2"])              # (B*S, 3D)
    Q2 = qkv[:, :D].reshape(B, S, D)
    K2 = qkv[:, D:2 * D].reshape(B, S, D)
    V2 = qkv[:, 2 * D:].reshape(B, S, D)
    zero_mask = jnp.zeros((B, 1, S), jnp.float32)
    batch_x = mab_block(Q2, K2, V2, zero_mask, params["o2"])               # (B, 75, D)

    # pool 3: GMPool_I -- PMA with a single seed (fused KV projection)
    Q3 = jnp.broadcast_to(params["q_seed3"][None], (B, NUM_SEEDS_POOL3, D))
    xf = batch_x.reshape(B * S, D)
    kv3 = matmul_bias(xf, params["w_kv3"], params["b_kv3"])                # (B*S, 2D)
    K3 = kv3[:, :D].reshape(B, S, D)
    V3 = kv3[:, D:].reshape(B, S, D)
    pooled = mab_block(Q3, K3, V3, zero_mask, params["o3"])                # (B, 1, D)

    h = matmul_bias(pooled.reshape(B, D), params["lin2"][0], params["lin2"][1])

    # ---- FC head: earlier fc layers tiled, last fc + out fused & lane-dense ----
    for wb in params["fc"][:-1]:
        h = matmul_bias(h, wb[0], wb[1], relu=True)
        # TODO(synk): Dropout(p=0.2) treated as eval-mode identity (no RNG dropout).
    out = fc_out_head(h, params["fc"][-1], params["out"])                  # (B, 1)
    return out


gcn_forward_jit = jax.jit(
    gcn_model_forward,
    static_argnames=("num_graphs", "max_nodes", "use_fused_stack"))


# ---------------------- float64 numpy reference (for checking) -------------
def _np_forward(params, x, edge_index, batch, num_graphs, max_nodes):
    p = {k: jax.tree_util.tree_map(lambda t: np.asarray(t, np.float64), v)
         for k, v in params.items()}
    x = np.asarray(x, np.float64)
    ei = np.asarray(edge_index)
    bvec = np.asarray(batch)
    n = x.shape[0]
    a = np.zeros((n, n))
    np.add.at(a, (ei[1], ei[0]), 1.0)
    a += np.eye(n)
    dis = 1.0 / np.sqrt(a.sum(1))
    a = a * dis[:, None] * dis[None, :]

    h = x
    for w, bb in p["conv"]:
        h = np.maximum(a @ (h @ w) + bb, 0.0)
    D = TRANS_HIDDEN
    h1 = h @ p["lin1"][0] + p["lin1"][1]
    k_nodes = a @ (h1 @ p["k1"][0]) + p["k1"][1]
    v_nodes = a @ (h1 @ p["v1"][0]) + p["v1"][1]

    Nk = _round_up(max(max_nodes, 8), 8)
    B = num_graphs
    Kd = np.zeros((B, Nk, D)); Vd = np.zeros((B, Nk, D)); msk = np.zeros((B, Nk), bool)
    counts = np.zeros(B, np.int64)
    for i in range(n):
        g = bvec[i]; pos = counts[g]; counts[g] += 1
        Kd[g, pos] = k_nodes[i]; Vd[g, pos] = v_nodes[i]; msk[g, pos] = True
    madd = np.where(msk, 0.0, -1e9)[:, None, :]

    def softmax(z):
        z = z - z.max(axis=-1, keepdims=True)
        e = np.exp(z)
        return e / e.sum(axis=-1, keepdims=True)

    def mab(Q, K, V, m, wo, bo):
        H = NUM_HEADS; dh = Q.shape[-1] // H
        outs = []
        for hh in range(H):
            qh = Q[:, :, hh * dh:(hh + 1) * dh]
            kh = K[:, :, hh * dh:(hh + 1) * dh]
            vh = V[:, :, hh * dh:(hh + 1) * dh]
            s = np.einsum('bqd,bkd->bqk', qh, kh) / math.sqrt(Q.shape[-1]) + m
            outs.append(np.einsum('bqk,bkd->bqd', softmax(s), vh))
        out = Q + np.concatenate(outs, -1)
        return out + np.maximum(out @ wo + bo, 0.0)

    q = p["S1"] @ p["q1"][0] + p["q1"][1]
    Q = np.broadcast_to(q[None], (B, NUM_SEEDS_POOL1, D))
    bx = mab(Q, Kd, Vd, madd, *p["o1"])
    S = NUM_SEEDS_POOL1
    zm = np.zeros((B, 1, S))
    bx = mab(bx @ p["q2"][0] + p["q2"][1], bx @ p["k2"][0] + p["k2"][1],
             bx @ p["v2"][0] + p["v2"][1], zm, *p["o2"])
    q3 = p["S3"] @ p["q3"][0] + p["q3"][1]
    Q3 = np.broadcast_to(q3[None], (B, 1, D))
    pooled = mab(Q3, bx @ p["k3"][0] + p["k3"][1], bx @ p["v3"][0] + p["v3"][1],
                 zm, *p["o3"])
    h = pooled[:, 0] @ p["lin2"][0] + p["lin2"][1]
    for w, bb in p["fc"]:
        h = np.maximum(h @ w + bb, 0.0)
    return h @ p["out"][0] + p["out"][1]


# --------------------------------- main ------------------------------------
if __name__ == "__main__":
    key = jax.random.PRNGKey(0)
    kx, kp, ka, kb = jax.random.split(key, 4)

    # --- unit test: tiled matmul kernel (multi-tile rows x K, resident RHS) ---
    a_t = jax.random.normal(ka, (300, 300), jnp.float32)
    b_t = jax.random.normal(kb, (300, 128), jnp.float32)
    bias_t = jnp.arange(128, dtype=jnp.float32) * 0.01
    got = matmul_bias(a_t, b_t, bias_t, relu=False)
    a_bf = np.asarray(a_t.astype(jnp.bfloat16).astype(jnp.float32), np.float64)
    b_bf = np.asarray(b_t.astype(jnp.bfloat16).astype(jnp.float32), np.float64)
    want = a_bf @ b_bf + np.asarray(bias_t, np.float64)[None, :]
    np.testing.assert_allclose(np.asarray(got, np.float64), want,
                               rtol=2e-3, atol=2e-3)

    # --- 2 small molecules: 6-node + 5-node chain graphs (both edge directions) ---
    n_nodes = 11
    x = jax.random.normal(kx, (n_nodes, NODE_FEAT_IN), jnp.float32)
    edges = []
    for lo, hi in [(0, 6), (6, 11)]:
        for i in range(lo, hi - 1):
            edges.append((i, i + 1))
            edges.append((i + 1, i))
    edge_index = jnp.asarray(np.asarray(edges, dtype=np.int32).T)        # (2, 18)
    edge_attr = jnp.ones((edge_index.shape[1], 1), jnp.float32)          # unused
    batch_np = np.array([0] * 6 + [1] * 5, dtype=np.int32)
    batch = jnp.asarray(batch_np)
    num_graphs = int(batch_np.max()) + 1
    max_nodes = int(np.bincount(batch_np).max())

    raw_params = init_params(kp)
    params = prepare_params(raw_params)

    out_fused = gcn_forward_jit(params, x, edge_index, edge_attr, batch,
                                num_graphs=num_graphs, max_nodes=max_nodes,
                                use_fused_stack=True)
    out_tiled = gcn_forward_jit(params, x, edge_index, edge_attr, batch,
                                num_graphs=num_graphs, max_nodes=max_nodes,
                                use_fused_stack=False)
    out_fused = jax.block_until_ready(out_fused)
    out_tiled = jax.block_until_ready(out_tiled)

    ref = _np_forward(raw_params, x, edge_index, batch, num_graphs, max_nodes)

    assert out_fused.shape == (num_graphs, 1)
    assert out_tiled.shape == (num_graphs, 1)
    assert bool(jnp.all(jnp.isfinite(out_fused)))
    assert bool(jnp.all(jnp.isfinite(out_tiled)))
    # bf16 MXU operands (f32 accumulation): loose tolerance vs the f64 reference,
    # tight tolerance between the two bf16 paths.
    assert float(np.max(np.abs(np.asarray(out_fused, np.float64) - ref))) < 2.5e-1
    assert float(np.max(np.abs(np.asarray(out_tiled, np.float64) - ref))) < 2.5e-1
    assert float(np.max(np.abs(np.asarray(out_fused) - np.asarray(out_tiled)))) < 5e-2
    print("KERNEL_OK")
</pallas_src>

<mosaic_0001>
module attributes {stable_mosaic.version = 11 : i64} {
  func.func @_matmul_kernel_multi(%arg0: i32, %arg1: i32, %arg2: memref<256x128xbf16, #tpu.memory_space<vmem>>, %arg3: memref<384x128xbf16, #tpu.memory_space<vmem>>, %arg4: memref<1x128xf32, #tpu.memory_space<vmem>>, %arg5: memref<256x128xf32, #tpu.memory_space<vmem>>, %arg6: memref<256x128xf32, #tpu.memory_space<vmem>>) attributes {dimension_semantics = [#tpu.dimension_semantics<parallel>, #tpu.dimension_semantics<arbitrary>], iteration_bounds = array<i64: 2, 3>, scalar_prefetch = 0 : i64, scratch_operands = 1 : i64, tpu.core_type = #tpu.core_type<tc>, window_params = [{transform_indices = @transform_0, window_bounds = array<i64: 256, 128>}, {pipeline_mode = #tpu.pipeline_mode<synchronous>, transform_indices = @transform_1, window_bounds = array<i64: 384, 128>}, {pipeline_mode = #tpu.pipeline_mode<synchronous>, transform_indices = @transform_2, window_bounds = array<i64: 1, 128>}, {transform_indices = @transform_3, window_bounds = array<i64: 256, 128>}]} {
    %c0_i32 = arith.constant 0 : i32
    %0 = arith.cmpi eq, %arg1, %c0_i32 : i32
    %1 = arith.extui %0 : i1 to i32
    %c0_i32_0 = arith.constant 0 : i32
    %2 = arith.cmpi ne, %1, %c0_i32_0 : i32
    scf.if %2 {
      %cst_8 = arith.constant 0.000000e+00 : f32
      %15 = vector.broadcast %cst_8 : f32 to vector<256x128xf32>
      %c0_9 = arith.constant 0 : index
      %c0_10 = arith.constant 0 : index
      %16 = vector.load %arg6[%c0_9, %c0_10] : memref<256x128xf32, #tpu.memory_space<vmem>>, vector<256x128xf32>
      tpu.vector_store %arg6[%c0_9, %c0_10], %15 {strides = array<i32>} : memref<256x128xf32, #tpu.memory_space<vmem>>, vector<256x128xf32>,
    } else {
    }
    %c128_i32 = arith.constant 128 : i32
    %3 = arith.muli %arg1, %c128_i32 : i32
    %4 = tpu.assume_multiple %3, 128 : i32
    %5 = arith.index_cast %4 : i32 to index
    %c0 = arith.constant 0 : index
    %6 = vector.load %arg3[%5, %c0] : memref<384x128xbf16, #tpu.memory_space<vmem>>, vector<128x128xbf16>
    %c0_1 = arith.constant 0 : index
    %c0_2 = arith.constant 0 : index
    %7 = vector.load %arg6[%c0_1, %c0_2] : memref<256x128xf32, #tpu.memory_space<vmem>>, vector<256x128xf32>
    %c0_3 = arith.constant 0 : index
    %c0_4 = arith.constant 0 : index
    %8 = vector.load %arg2[%c0_3, %c0_4] : memref<256x128xbf16, #tpu.memory_space<vmem>>, vector<256x128xbf16>
    %cst = arith.constant dense<0.000000e+00> : vector<256x128xf32>
    %9 = tpu.matmul %8, %6, %cst {dimension_numbers = #tpu.dot_dimension_numbers<[1], [0], [0], [1], [0, 0, 1, 1], [], []>} : vector<256x128xbf16>, vector<128x128xbf16>, vector<256x128xf32> -> vector<256x128xf32>
    %10 = arith.addf %7, %9 : vector<256x128xf32>
    %c0_5 = arith.constant 0 : index
    %c0_6 = arith.constant 0 : index
    %11 = vector.load %arg6[%c0_5, %c0_6] : memref<256x128xf32, #tpu.memory_space<vmem>>, vector<256x128xf32>
    tpu.vector_store %arg6[%c0_5, %c0_6], %10 {strides = array<i32>} : memref<256x128xf32, #tpu.memory_space<vmem>>, vector<256x128xf32>,
    %c2_i32 = arith.constant 2 : i32
    %12 = arith.cmpi eq, %arg1, %c2_i32 : i32
    %13 = arith.extui %12 : i1 to i32
    %c0_i32_7 = arith.constant 0 : i32
    %14 = arith.cmpi ne, %13, %c0_i32_7 : i32
    scf.if %14 {
      %c0_8 = arith.constant 0 : index
      %c0_9 = arith.constant 0 : index
      %15 = vector.load %arg6[%c0_8, %c0_9] : memref<256x128xf32, #tpu.memory_space<vmem>>, vector<256x128xf32>
      %c0_10 = arith.constant 0 : index
      %c0_11 = arith.constant 0 : index
      %16 = vector.load %arg4[%c0_10, %c0_11] : memref<1x128xf32, #tpu.memory_space<vmem>>, vector<1x128xf32>
      %17 = vector.broadcast %16 : vector<1x128xf32> to vector<256x128xf32>
      %18 = arith.addf %15, %17 : vector<256x128xf32>
      %c0_12 = arith.constant 0 : index
      %c0_13 = arith.constant 0 : index
      %19 = vector.load %arg5[%c0_12, %c0_13] : memref<256x128xf32, #tpu.memory_space<vmem>>, vector<256x128xf32>
      tpu.vector_store %arg5[%c0_12, %c0_13], %18 {strides = array<i32>} : memref<256x128xf32, #tpu.memory_space<vmem>>, vector<256x128xf32>,
    } else {
    }
    return
  }
  func.func @transform_0(%arg0: i32, %arg1: i32) -> (i32, i32) {
    %c0_i32 = arith.constant 0 : i32
    return %arg0, %arg1 : i32, i32
  }
  func.func @transform_1(%arg0: i32, %arg1: i32) -> (i32, i32) {
    %c0_i32 = arith.constant 0 : i32
    %c0_i32_0 = arith.constant 0 : i32
    %c0_i32_1 = arith.constant 0 : i32
    return %c0_i32, %c0_i32_0 : i32, i32
  }
  func.func @transform_2(%arg0: i32, %arg1: i32) -> (i32, i32) {
    %c0_i32 = arith.constant 0 : i32
    %c0_i32_0 = arith.constant 0 : i32
    %c0_i32_1 = arith.constant 0 : i32
    return %c0_i32, %c0_i32_0 : i32, i32
  }
  func.func @transform_3(%arg0: i32, %arg1: i32) -> (i32, i32) {
    %c0_i32 = arith.constant 0 : i32
    %c0_i32_0 = arith.constant 0 : i32
    return %arg0, %c0_i32 : i32, i32
  }
}

</mosaic_0001>

<bundles_post_ra>
// kernel: tpu_custom_call.1
= control target key start
LH: loop header
LB: loop body
LE: loop exit
PB: predicated region body
PF: predicated region fallthrough
CT: control target
= control target key end

     0   :  { %s1668_s0 = inlined_call_operand.hbm [shape: bf16[512,384], index: 0, kind: input, shape index: {}]   ;;  %s1669_s1 = inlined_call_operand.hbm [shape: bf16[384,128], index: 1, kind: input, shape index: {}]   ;;  %s1670_s2 = inlined_call_operand.vmem [shape: f32[1,128], index: 2, kind: input, shape index: {}]   ;;  %s1671_s3 = inlined_call_operand.hbm [shape: f32[512,128], index: 3, kind: output, shape index: {}]  }
   0x1   :  { %1681 = sst [smem:[#allocation18_spill]] %s1669_s1 }
   0x2   :  { %1682 = sst [smem:[#allocation19_spill]] %s1670_s2 }
   0x3   :  { %1683 = sst [smem:[#allocation20_spill]] %s1671_s3 }
   0x4   :  { %8 = vsyncpa [#allocation4], 0 }
   0x5   :  { %10 = vsyncpa [#allocation4 + $0x1], 0 }
   0x6   :  { %11 = vsyncpa [#allocation7], 0 }
   0x7   :  { %12 = vsyncpa [#allocation5], 0 }
   0x8   :  { %14 = vsyncpa [#allocation5 + $0x1], 0  ;;  %s1365_s12 = smov 0   ;;  %s1367_s13 = smov 0  }
   0x9   :  { %s1369_s14 = smov 0   ;;  %s1371_s15 = smov 0  }
   0xa   :  { %s1373_s16 = smov 0   ;;  %s1375_s17 = smov 0  }
   0xb   :  { %s1377_s18 = smov 0   ;;  %s1379_s19 = smov 0  }
   0xc   :  { %s1381_s20 = smov 0   ;;  %s1383_s21 = smov 0  }
   0xd   :  { %s1385_s22 = smov 0  }
   0xe LB: > { %1684 = sst [smem:[#allocation12_spill]] %s1296_s12  ;;  %s862_s23 = sadd.s32 4294967295, %s1336_s22   ;;  %s1336_s22 = sphi %s1385_s22, %s20_s22   ;;  %s1332_s21 = sphi %s1383_s21, %s1716_s21   ;;  %s1328_s20 = sphi %s1381_s20, %s1715_s20   ;;  %s1324_s19 = sphi %s1379_s19, %s1714_s19   ;;  %s1320_s18 = sphi %s1377_s18, %s1713_s18   ;;  %s1316_s17 = sphi %s1375_s17, %s1712_s17   ;;  %s1312_s16 = sphi %s1373_s16, %s1711_s16   ;;  %s1308_s15 = sphi %s1371_s15, %s1710_s15   ;;  %s1304_s14 = sphi %s1369_s14, %s1709_s14   ;;  %s1300_s13 = sphi %s1367_s13, %s1708_s13   ;;  %s1296_s12 = sphi %s1365_s12, %s1707_s12  }
   0xf   : > { %1685 = sst [smem:[#allocation13_spill]] %s1324_s19  ;;  %s863_s24 = sadd.s32 4294967294, %s1336_s22  }
  0x10   : > { %p54_p0 = scmp.ne.s32.totalorder %s1312_s16, %s1308_s15  ;;  %p1421_p1 = scmp.eq.s32.totalorder %s862_s23, 0 }
  0x11   : > { %p119_p2 = scmp.ne.s32.totalorder %s1304_s14, %s1300_s13  ;;  %p120_p3 = scmp.eq.s32.totalorder %s862_s23, 5 }
  0x12   : > { %p1429_p4 = por %p1421_p1, %p54_p0  ;;  %p125_p5 = scmp.ne.s32.totalorder %s1300_s13, %s1296_s12 }
  0x13   : > { %p1435_p6 = por %p120_p3, %p119_p2  ;;  %p126_p7 = scmp.eq.s32.totalorder %s863_s24, 5 }
  0x14   : > { %p864_p8 = scmp.ge.s32.totalorder %s1336_s22, 1  ;;  %p133_p9 = scmp.lt.s32.totalorder %s1336_s22, 7 }
  0x15   : > { %s1688_s27 = scalar_select %p1435_p6, 1, 0 }
  0x16   : > { %p1441_p10 = por %p126_p7, %p125_p5  ;;  %p1445_p11 = pnand %p864_p8, %p133_p9 }
  0x17   : > { %1689 = sst [smem:[#allocation14_spill]] %s1688_s27  ;;  %s1338_s6 = smov [#allocation6]  }
  0x18   : > { %s1690_s28 = scalar_select %p1441_p10, 1, 0 }
  0x19   : > { %s1693_s1 = sld [smem:[#allocation18_spill]]  ;;  %p1038_p12 = pneg %p1445_p11 }
  0x1a   : > { %1691 = sst [smem:[#allocation15_spill]] %s1690_s28  ;;  %s146_s7 = sshll.u32 %s1338_s6, 4  ;;  %s147_s7 = int_to_ptr.vmem [resolvable:$true] %s146_s7 }
  0x1b   : > { %p1039_p13 = pnand %p1038_p12, %p1421_p1  ;;  %s1672_s8 = smov 64  }
  0x1c   : > { %s1673_s9 = smov 4   ;;  %s29_s10 = sadd.s32 1, %s1328_s20 }
  0x1d   : > { %s32_s11 = sadd.s32 1, %s1332_s21  ;;  %p30_p0 = scmp.ge.s32.totalorder %s29_s10, 3 }
  0x1e   : > { %s41_s15 = sadd.s32 1, %s1316_s17  ;;  %p48_p2 = scmp.ne.s32.totalorder %s1316_s17, %s1312_s16 }
  0x1f   : > { %s144_s5 = sshll.u32 %s1693_s1, 4  ;;  %p49_p3 = scmp.eq.s32.totalorder %s1336_s22, 0  ;;  %s145_s5 = int_to_ptr.hbm [resolvable:$true] %s144_s5 }
  0x20   : > { %1041 = dma.hbm_to_vmem [thread:$0]  (!%p1039_p13), %s145_s5, 3072, %s147_s7, [#allocation7], %s1672_s8, %s1672_s8, %s1673_s9  }
  0x21   : > { %s1718_s10 = smov (%p30_p0, %s29_s10), 0  ;;  %s1720_s11 = smov (!%p30_p0, %s32_s11), %s1332_s21 }
  0x22   : > { %1694 = sst [smem:[#allocation16_spill]] %s1718_s10  ;;  %s37_s23 = ssub.s32 %s1328_s20, %s1718_s10 }
  0x23   : > { %p1470_p5 = por %p49_p3, %p48_p2  ;;  %p34_p7 = scmp.ge.s32.totalorder %s1720_s11, 2 }
  0x24   : > { %s109_s30 = sadd.s32 1, %s1304_s14  ;;  %p1051_p8 = scmp.lt.s32.totalorder %s1336_s22, 6 }
  0x25   : > { %s163_s4 = sand.u32 1, %s1316_s17   ;;  %s1722_s11 = smov (%p34_p7, %s1720_s11), 0 }
  0x26   : > { %1696 = sst [smem:[#allocation17_spill]] %s1722_s11  ;;  %s867_s5 = sshll.u32 %s163_s4, 7 }
  0x27   : > { %s36_s6 = ssub.s32 %s1332_s21, %s1722_s11  ;;  %s1029_s8 = smul.u32 96, %s1332_s21 }
  0x28   : > { %s38_s7 = sor.u32 %s37_s23, %s36_s6  ;;  %p107_p9 = scmp.eq.s32.totalorder %s36_s6, 0 }
  0x29   : > { %p39_p12 = scmp.eq.s32.totalorder %s38_s7, 0  ;;  %s172_s10 = sadd.s32 %s1328_s20, %s1029_s8 }
  0x2a   : > { %s1483_s9 = scalar_select %p107_p9, %s1304_s14, %s109_s30  }
  0x2b   : > { %s1486_s1 = scalar_select %p39_p12, %s1316_s17, %s41_s15  }
  0x2c   : > { %s167_s28 = scalar_lea.vmem [#allocation3], %s867_s5  ;;  %s870_s3 = sshll.u32 %s172_s10, 2 }
  0x2d   : > { %s177_s12 = sshll.u32 %s167_s28, 4  ;;  %s174_s2 = scalar_lea.hbm %s1668_s0, %s870_s3  ;;  %s178_s12 = int_to_ptr.vmem [resolvable:$true] %s177_s12 }
  0x2e   : > { %p1043_p13 = pnand %p1051_p8, %p1470_p5  ;;  %s175_s23 = sshll.u32 %s174_s2, 4  ;;  %s176_s23 = int_to_ptr.hbm [resolvable:$true] %s175_s23 }
  0x2f   : > { %s164_s6 = scalar_lea.sflag [#allocation4], %s163_s4  ;;  %s1341_s7 = smov 192  }
  0x30   : > { %s1697_s30 = smov 4   ;;  %s1698_s11 = smov 64  }
  0x31   : > { %1045 = dma.hbm_to_vmem [thread:$0]  (!%p1043_p13), %s176_s23, 2048, %s178_s12, %s164_s6, %s1341_s7, %s1698_s11, %s1697_s30  }
  0x32   : > { %189 = sbr.rel (%p1445_p11) target bundleno = 384 (0x180), region = 32  ;;  %s191_s28 = sand.u32 (!%p1445_p11), 1, %s1312_s16  }
  0x33   : > { %s872_s8 = sshll.u32 (!%p1445_p11), %s191_s28, 7  ;;  %s192_s10 = scalar_lea.sflag (!%p1445_p11), [#allocation4], %s191_s28 }
  0x34   : > { %s1501_s19 = scalar_lea.vmem (!%p1445_p11), [#allocation3], %s872_s8 }
  0x37   : > { %1283 = dma.done.wait (%p1429_p4), %s192_s10, 2048  }
  0x38   : > { %1285 = vsyncadd (%p1429_p4), %s192_s10, 4294965248 }
  0x39   : > { %1287 = dma.done.wait (%p1421_p1), [#allocation7], 3072  }
  0x3a   : > { %1289 = vsyncadd (%p1421_p1), [#allocation7], 4294964224  ;;  %s221_s2 = sand.u32 1, %s1300_s13   ;;  %p875_p11 = scmp.ne.s32.totalorder %s1320_s18, 0 }
  0x3b   : > { %s874_s3 = sshll.u32 %s221_s2, 8 }
  0x3c   : > { %s1514_s12 = scalar_lea.vmem [#allocation8], %s874_s3  ;;  %229 = sbr.rel (%p875_p11) target bundleno = 98 (0x62), region = 44 }
  0x41   : > { %v1342_v0 = vmov 0.0  }
  0x42   : > { %230 = vst [vmem:[#allocation2 + $0xb0] sm:$0xff] %v1342_v0 }
  0x43   : > { %231 = vst [vmem:[#allocation2] sm:$0xff] %v1342_v0 }
  0x44   : > { %232 = vst [vmem:[#allocation2 + $0xd8] sm:$0xff] %v1342_v0 }
  0x45   : > { %233 = vst [vmem:[#allocation2 + $0x18] sm:$0xff] %v1342_v0 }
  0x46   : > { %234 = vst [vmem:[#allocation2 + $0x50] sm:$0xff] %v1342_v0 }
  0x47   : > { %235 = vst [vmem:[#allocation2 + $0x68] sm:$0xff] %v1342_v0 }
  0x48   : > { %236 = vst [vmem:[#allocation2 + $0x30] sm:$0xff] %v1342_v0 }
  0x49   : > { %237 = vst [vmem:[#allocation2 + $0x48] sm:$0xff] %v1342_v0 }
  0x4a   : > { %238 = vst [vmem:[#allocation2 + $0x80] sm:$0xff] %v1342_v0 }
  0x4b   : > { %239 = vst [vmem:[#allocation2 + $0x88] sm:$0xff] %v1342_v0 }
  0x4c   : > { %240 = vst [vmem:[#allocation2 + $0xe8] sm:$0xff] %v1342_v0 }
  0x4d   : > { %241 = vst [vmem:[#allocation2 + $0xb8] sm:$0xff] %v1342_v0 }
  0x4e   : > { %242 = vst [vmem:[#allocation2 + $0x60] sm:$0xff] %v1342_v0 }
  0x4f   : > { %243 = vst [vmem:[#allocation2 + $0xf0] sm:$0xff] %v1342_v0 }
  0x50   : > { %244 = vst [vmem:[#allocation2 + $0x8] sm:$0xff] %v1342_v0 }
  0x51   : > { %245 = vst [vmem:[#allocation2 + $0x78] sm:$0xff] %v1342_v0 }
  0x52   : > { %246 = vst [vmem:[#allocation2 + $0x38] sm:$0xff] %v1342_v0 }
  0x53   : > { %247 = vst [vmem:[#allocation2 + $0x58] sm:$0xff] %v1342_v0 }
  0x54   : > { %248 = vst [vmem:[#allocation2 + $0x40] sm:$0xff] %v1342_v0 }
  0x55   : > { %249 = vst [vmem:[#allocation2 + $0xc8] sm:$0xff] %v1342_v0 }
  0x56   : > { %250 = vst [vmem:[#allocation2 + $0xe0] sm:$0xff] %v1342_v0 }
  0x57   : > { %251 = vst [vmem:[#allocation2 + $0x90] sm:$0xff] %v1342_v0 }
  0x58   : > { %252 = vst [vmem:[#allocation2 + $0x70] sm:$0xff] %v1342_v0 }
  0x59   : > { %253 = vst [vmem:[#allocation2 + $0xc0] sm:$0xff] %v1342_v0 }
  0x5a   : > { %254 = vst [vmem:[#allocation2 + $0xa8] sm:$0xff] %v1342_v0 }
  0x5b   : > { %255 = vst [vmem:[#allocation2 + $0xd0] sm:$0xff] %v1342_v0 }
  0x5c   : > { %256 = vst [vmem:[#allocation2 + $0x10] sm:$0xff] %v1342_v0 }
  0x5d   : > { %257 = vst [vmem:[#allocation2 + $0x28] sm:$0xff] %v1342_v0 }
  0x5e   : > { %258 = vst [vmem:[#allocation2 + $0xa0] sm:$0xff] %v1342_v0 }
  0x5f   : > { %259 = vst [vmem:[#allocation2 + $0xf8] sm:$0xff] %v1342_v0 }
  0x60   : > { %260 = vst [vmem:[#allocation2 + $0x20] sm:$0xff] %v1342_v0 }
  0x61   : > { %261 = vst [vmem:[#allocation2 + $0x98] sm:$0xff] %v1342_v0 }
  0x62 PF: > { %s876_s25 = sshll.u32 %s1320_s18, 7  ;;  %v988_v9 = vld [vmem:[%s1501_s19] sm:$0xff]  ;;  %v989_v13 = vld [vmem:[%s1501_s19 + $0x8] sm:$0xff]  ;;  %v990_v17 = vld [vmem:[%s1501_s19 + $0x10] sm:$0xff]  ;;  %p974_p1 = scmp.ne.s32.totalorder %s1320_s18, 2 }
  0x63   : > { %s263_s26 = sshra.s32 %s876_s25, 3  ;;  %v992_v10 = vld [vmem:[%s1501_s19 + $0x20] sm:$0xff]  ;;  %v993_v14 = vld [vmem:[%s1501_s19 + $0x28] sm:$0xff]  ;;  %v994_v18 = vld [vmem:[%s1501_s19 + $0x30] sm:$0xff]  ;;  %s1699_s24 = sld [smem:[#allocation19_spill]] (!%p974_p1) }
  0x64   : > { %s877_s27 = sshll.u32 %s263_s26, 2  ;;  %v996_v11 = vld [vmem:[%s1501_s19 + $0x40] sm:$0xff]  ;;  %v997_v15 = vld [vmem:[%s1501_s19 + $0x48] sm:$0xff]  ;;  %v998_v19 = vld [vmem:[%s1501_s19 + $0x50] sm:$0xff] }
  0x65   : > { %s1518_s29 = scalar_lea.vmem [#allocation6], %s877_s27  ;;  %v1000_v12 = vld [vmem:[%s1501_s19 + $0x60] sm:$0xff]  ;;  %v1001_v16 = vld [vmem:[%s1501_s19 + $0x68] sm:$0xff]  ;;  %v1002_v20 = vld [vmem:[%s1501_s19 + $0x70] sm:$0xff] }
  0x66   : > { %v987_v1 = vld [vmem:[%s1518_s29 + $0x38] sm:$0xff]  ;;  %v986_v2 = vld [vmem:[%s1518_s29 + $0x30] sm:$0xff]  ;;  %v985_v3 = vld [vmem:[%s1518_s29 + $0x28] sm:$0xff] }
  0x67   : > { %491 = vmatpush.bf16.msra.mxu0 %v987_v1  ;;  %1005 = vmatpush.bf16.msra.mxu1 %v987_v1  ;;  %v984_v4 = vld [vmem:[%s1518_s29 + $0x20] sm:$0xff]  ;;  %v983_v5 = vld [vmem:[%s1518_s29 + $0x18] sm:$0xff]  ;;  %v982_v6 = vld [vmem:[%s1518_s29 + $0x10] sm:$0xff] }
  0x68   : > { %1006 = vmatpush.bf16.msra.mxu2 %v987_v1  ;;  %1007 = vmatpush.bf16.msra.mxu3 %v987_v1  ;;  %v981_v7 = vld [vmem:[%s1518_s29 + $0x8] sm:$0xff]  ;;  %v980_v8 = vld [vmem:[%s1518_s29] sm:$0xff]  ;;  %v991_v21 = vld [vmem:[%s1501_s19 + $0x18] sm:$0xff] }
  0x69   : > { %v995_v22 = vld [vmem:[%s1501_s19 + $0x38] sm:$0xff]  ;;  %v283_v25 = vld [vmem:[#allocation2 + $0xb0] sm:$0xff]  ;;  %v291_v26 = vld [vmem:[#allocation2 + $0x80] sm:$0xff] }
  0x6a   : > { %v999_v23 = vld [vmem:[%s1501_s19 + $0x58] sm:$0xff]  ;;  %v307_v32 = vld [vmem:[#allocation2 + $0xa8] sm:$0xff]  ;;  %v284_v33 = vld [vmem:[#allocation2] sm:$0xff] }
  0x6b   : > { %492 = vmatpush.bf16.msra.mxu0 %v986_v2  ;;  %1008 = vmatpush.bf16.msra.mxu1 %v986_v2  ;;  %v1003_v24 = vld [vmem:[%s1501_s19 + $0x78] sm:$0xff]  ;;  %v292_v34 = vld [vmem:[#allocation2 + $0x88] sm:$0xff]  ;;  %v308_v44 = vld [vmem:[#allocation2 + $0xd0] sm:$0xff] }
  0x6c   : > { %1009 = vmatpush.bf16.msra.mxu2 %v986_v2  ;;  %1010 = vmatpush.bf16.msra.mxu3 %v986_v2  ;;  %v299_v31 = vld [vmem:[#allocation2 + $0x38] sm:$0xff]  ;;  %v293_v46 = vld [vmem:[#allocation2 + $0xe8] sm:$0xff]  ;;  %v301_v55 = vld [vmem:[#allocation2 + $0x40] sm:$0xff] }
  0x6d   : > { %v300_v43 = vld [vmem:[#allocation2 + $0x58] sm:$0xff]  ;;  %v309_v56 = vld [vmem:[#allocation2 + $0x10] sm:$0xff] }
  0x6e   : > { %v285_v45 = vld [vmem:[#allocation2 + $0xd8] sm:$0xff] }
  0x6f   : > { %493 = vmatpush.bf16.msra.mxu0 %v985_v3  ;;  %1011 = vmatpush.bf16.msra.mxu1 %v985_v3  ;;  %v286_v57 = vld [vmem:[#allocation2 + $0x18] sm:$0xff] }
  0x70   : > { %1012 = vmatpush.bf16.msra.mxu2 %v985_v3  ;;  %1013 = vmatpush.bf16.msra.mxu3 %v985_v3  ;;  %v294_v58 = vld [vmem:[#allocation2 + $0xb8] sm:$0xff]  ;;  %v302_v3 = vld [vmem:[#allocation2 + $0xc8] sm:$0xff] }
  0x73   : > { %494 = vmatpush.bf16.msra.mxu0 %v984_v4  ;;  %1014 = vmatpush.bf16.msra.mxu1 %v984_v4 }
  0x74   : > { %1015 = vmatpush.bf16.msra.mxu2 %v984_v4  ;;  %1016 = vmatpush.bf16.msra.mxu3 %v984_v4  ;;  %v310_v4 = vld [vmem:[#allocation2 + $0x28] sm:$0xff] }
  0x77   : > { %495 = vmatpush.bf16.msra.mxu0 %v983_v5  ;;  %1017 = vmatpush.bf16.msra.mxu1 %v983_v5 }
  0x78   : > { %1018 = vmatpush.bf16.msra.mxu2 %v983_v5  ;;  %1019 = vmatpush.bf16.msra.mxu3 %v983_v5  ;;  %v287_v5 = vld [vmem:[#allocation2 + $0x50] sm:$0xff] }
  0x7b   : > { %496 = vmatpush.bf16.msra.mxu0 %v982_v6  ;;  %1020 = vmatpush.bf16.msra.mxu1 %v982_v6 }
  0x7c   : > { %1021 = vmatpush.bf16.msra.mxu2 %v982_v6  ;;  %1022 = vmatpush.bf16.msra.mxu3 %v982_v6  ;;  %v295_v6 = vld [vmem:[#allocation2 + $0x60] sm:$0xff] }
  0x7f   : > { %497 = vmatpush.bf16.msra.mxu0 %v981_v7  ;;  %1023 = vmatpush.bf16.msra.mxu1 %v981_v7 }
  0x80   : > { %1024 = vmatpush.bf16.msra.mxu2 %v981_v7  ;;  %1025 = vmatpush.bf16.msra.mxu3 %v981_v7 }
  0x83   : > { %498 = vmatpush.bf16.msra.mxu0 %v980_v8  ;;  %1026 = vmatpush.bf16.msra.mxu1 %v980_v8 }
  0x84   : > { %1027 = vmatpush.bf16.msra.mxu2 %v980_v8  ;;  %1028 = vmatpush.bf16.msra.mxu3 %v980_v8 }
  0x86   : > { %499 = vmatmul.bf16.vlgmr.msra.gmra.mxu0 %v988_v9  ;;  %519 = vmatmul.bf16.vlgmr.msra.gmra.mxu1 %v992_v10 }
  0x87   : > { %539 = vmatmul.bf16.vlgmr.msra.gmra.mxu2 %v996_v11  ;;  %559 = vmatmul.bf16.vlgmr.msra.gmra.mxu3 %v1000_v12 }
  0x96   : > { %504 = vmatmul.bf16.gmra.mxu0 %v989_v13  ;;  %524 = vmatmul.bf16.gmra.mxu1 %v993_v14 }
  0x97   : > { %544 = vmatmul.bf16.gmra.mxu2 %v997_v15  ;;  %564 = vmatmul.bf16.gmra.mxu3 %v1001_v16  ;;  %v303_v15 = vld [vmem:[#allocation2 + $0xe0] sm:$0xff] }
  0x98   : > { %v311_v16 = vld [vmem:[#allocation2 + $0xa0] sm:$0xff] }
  0xa6   : > { %509 = vmatmul.bf16.gmra.mxu0 %v990_v17  ;;  %529 = vmatmul.bf16.gmra.mxu1 %v994_v18  ;;  %v288_v17 = vld [vmem:[#allocation2 + $0x68] sm:$0xff]  ;;  %v296_v18 = vld [vmem:[#allocation2 + $0xf0] sm:$0xff] }
  0xa7   : > { %549 = vmatmul.bf16.gmra.mxu2 %v998_v19  ;;  %569 = vmatmul.bf16.gmra.mxu3 %v1002_v20 }
  0xb6   : > { %514 = vmatmul.bf16.gmra.mxu0 %v991_v21  ;;  %534 = vmatmul.bf16.gmra.mxu1 %v995_v22 }
  0xb7   : > { %554 = vmatmul.bf16.gmra.mxu2 %v999_v23  ;;  %574 = vmatmul.bf16.gmra.mxu3 %v1003_v24 }
 0x103   : > { %v500_v27 = vpop.f32.mrf.mxu0  ;;  %v520_v28 = vpop.f32.mrf.mxu1 }
 0x104   : > { %v580_v29 = vadd.f32 %v500_v27, %v283_v25  ;;  %v588_v30 = vadd.f32 %v520_v28, %v291_v26  ;;  %v304_v27 = vld [vmem:[#allocation2 + $0x90] sm:$0xff]  ;;  %v312_v28 = vld [vmem:[#allocation2 + $0xf8] sm:$0xff] }
 0x106   : > { %612 = vst [vmem:[#allocation2 + $0xb0] sm:$0xff] %v580_v29  ;;  %v289_v29 = vld [vmem:[#allocation2 + $0x30] sm:$0xff] }
 0x107   : > { %620 = vst [vmem:[#allocation2 + $0x80] sm:$0xff] %v588_v30  ;;  %v297_v30 = vld [vmem:[#allocation2 + $0x8] sm:$0xff] }
 0x10a   : > { %v540_v35 = vpop.f32.mrf.mxu2  ;;  %v560_v36 = vpop.f32.mrf.mxu3 }
 0x10b   : > { %v596_v37 = vadd.f32 %v540_v35, %v299_v31  ;;  %v604_v38 = vadd.f32 %v560_v36, %v307_v32  ;;  %v502_v39 = vpop.f32.mrf.mxu0  ;;  %v522_v40 = vpop.f32.mrf.mxu1 }
 0x10c   : > { %v581_v41 = vadd.f32 %v502_v39, %v284_v33  ;;  %v589_v42 = vadd.f32 %v522_v40, %v292_v34  ;;  %v305_v39 = vld [vmem:[#allocation2 + $0x70] sm:$0xff]  ;;  %v313_v40 = vld [vmem:[#allocation2 + $0x20] sm:$0xff] }
 0x10d   : > { %628 = vst [vmem:[#allocation2 + $0x38] sm:$0xff] %v596_v37 }
 0x10e   : > { %636 = vst [vmem:[#allocation2 + $0xa8] sm:$0xff] %v604_v38 }
 0x10f   : > { %613 = vst [vmem:[#allocation2] sm:$0xff] %v581_v41  ;;  %v290_v41 = vld [vmem:[#allocation2 + $0x48] sm:$0xff] }
 0x110   : > { %621 = vst [vmem:[#allocation2 + $0x88] sm:$0xff] %v589_v42  ;;  %v298_v42 = vld [vmem:[#allocation2 + $0x78] sm:$0xff] }
 0x112   : > { %v542_v47 = vpop.f32.mrf.mxu2  ;;  %v562_v48 = vpop.f32.mrf.mxu3 }
 0x113   : > { %v597_v49 = vadd.f32 %v542_v47, %v300_v43  ;;  %v605_v50 = vadd.f32 %v562_v48, %v308_v44  ;;  %v505_v51 = vpop.f32.mrf.mxu0  ;;  %v525_v52 = vpop.f32.mrf.mxu1 }
 0x114   : > { %v582_v53 = vadd.f32 %v505_v51, %v285_v45  ;;  %v590_v54 = vadd.f32 %v525_v52, %v293_v46  ;;  %v306_v51 = vld [vmem:[#allocation2 + $0xc0] sm:$0xff]  ;;  %v314_v52 = vld [vmem:[#allocation2 + $0x98] sm:$0xff] }
 0x115   : > { %629 = vst [vmem:[#allocation2 + $0x58] sm:$0xff] %v597_v49 }
 0x116   : > { %637 = vst [vmem:[#allocation2 + $0xd0] sm:$0xff] %v605_v50 }
 0x117   : > { %614 = vst [vmem:[#allocation2 + $0xd8] sm:$0xff] %v582_v53 }
 0x118   : > { %622 = vst [vmem:[#allocation2 + $0xe8] sm:$0xff] %v590_v54 }
 0x11a   : > { %v545_v59 = vpop.f32.mrf.mxu2  ;;  %v565_v60 = vpop.f32.mrf.mxu3 }
 0x11b   : > { %v598_v61 = vadd.f32 %v545_v59, %v301_v55  ;;  %v606_v62 = vadd.f32 %v565_v60, %v309_v56  ;;  %v507_v63 = vpop.f32.mrf.mxu0  ;;  %v527_v0 = vpop.f32.mrf.mxu1 }
 0x11c   : > { %v583_v1 = vadd.f32 %v507_v63, %v286_v57  ;;  %v591_v2 = vadd.f32 %v527_v0, %v294_v58 }
 0x11d   : > { %630 = vst [vmem:[#allocation2 + $0x40] sm:$0xff] %v598_v61 }
 0x11e   : > { %638 = vst [vmem:[#allocation2 + $0x10] sm:$0xff] %v606_v62 }
 0x11f   : > { %615 = vst [vmem:[#allocation2 + $0x18] sm:$0xff] %v583_v1 }
 0x120   : > { %623 = vst [vmem:[#allocation2 + $0xb8] sm:$0xff] %v591_v2 }
 0x122   : > { %v547_v7 = vpop.f32.mrf.mxu2  ;;  %v567_v8 = vpop.f32.mrf.mxu3 }
 0x123   : > { %v599_v9 = vadd.f32 %v547_v7, %v302_v3  ;;  %v607_v10 = vadd.f32 %v567_v8, %v310_v4  ;;  %v510_v11 = vpop.f32.mrf.mxu0  ;;  %v530_v12 = vpop.f32.mrf.mxu1 }
 0x124   : > { %v584_v13 = vadd.f32 %v510_v11, %v287_v5  ;;  %v592_v14 = vadd.f32 %v530_v12, %v295_v6 }
 0x125   : > { %631 = vst [vmem:[#allocation2 + $0xc8] sm:$0xff] %v599_v9 }
 0x126   : > { %639 = vst [vmem:[#allocation2 + $0x28] sm:$0xff] %v607_v10 }
 0x127   : > { %616 = vst [vmem:[#allocation2 + $0x50] sm:$0xff] %v584_v13 }
 0x128   : > { %624 = vst [vmem:[#allocation2 + $0x60] sm:$0xff] %v592_v14 }
 0x12a   : > { %v550_v19 = vpop.f32.mrf.mxu2  ;;  %v570_v20 = vpop.f32.mrf.mxu3 }
 0x12b   : > { %v600_v21 = vadd.f32 %v550_v19, %v303_v15  ;;  %v608_v22 = vadd.f32 %v570_v20, %v311_v16  ;;  %v512_v23 = vpop.f32.mrf.mxu0  ;;  %v532_v24 = vpop.f32.mrf.mxu1 }
 0x12c   : > { %v585_v25 = vadd.f32 %v512_v23, %v288_v17  ;;  %v593_v26 = vadd.f32 %v532_v24, %v296_v18 }
 0x12d   : > { %632 = vst [vmem:[#allocation2 + $0xe0] sm:$0xff] %v600_v21 }
 0x12e   : > { %640 = vst [vmem:[#allocation2 + $0xa0] sm:$0xff] %v608_v22 }
 0x12f   : > { %617 = vst [vmem:[#allocation2 + $0x68] sm:$0xff] %v585_v25 }
 0x130   : > { %625 = vst [vmem:[#allocation2 + $0xf0] sm:$0xff] %v593_v26 }
 0x132   : > { %v552_v31 = vpop.f32.mrf.mxu2  ;;  %v572_v32 = vpop.f32.mrf.mxu3 }
 0x133   : > { %v601_v33 = vadd.f32 %v552_v31, %v304_v27  ;;  %v609_v34 = vadd.f32 %v572_v32, %v312_v28  ;;  %v515_v35 = vpop.f32.mrf.mxu0  ;;  %v535_v36 = vpop.f32.mrf.mxu1 }
 0x134   : > { %v586_v37 = vadd.f32 %v515_v35, %v289_v29  ;;  %v594_v38 = vadd.f32 %v535_v36, %v297_v30 }
 0x135   : > { %633 = vst [vmem:[#allocation2 + $0x90] sm:$0xff] %v601_v33 }
 0x136   : > { %641 = vst [vmem:[#allocation2 + $0xf8] sm:$0xff] %v609_v34 }
 0x137   : > { %618 = vst [vmem:[#allocation2 + $0x30] sm:$0xff] %v586_v37 }
 0x138   : > { %626 = vst [vmem:[#allocation2 + $0x8] sm:$0xff] %v594_v38 }
 0x13a   : > { %v555_v43 = vpop.f32.mrf.mxu2  ;;  %v575_v44 = vpop.f32.mrf.mxu3 }
 0x13b   : > { %v602_v45 = vadd.f32 %v555_v43, %v305_v39  ;;  %v610_v46 = vadd.f32 %v575_v44, %v313_v40  ;;  %v517_v47 = vpop.f32.mrf.mxu0  ;;  %v537_v48 = vpop.f32.mrf.mxu1 }
 0x13c   : > { %v587_v49 = vadd.f32 %v517_v47, %v290_v41  ;;  %v595_v50 = vadd.f32 %v537_v48, %v298_v42 }
 0x13d   : > { %634 = vst [vmem:[#allocation2 + $0x70] sm:$0xff] %v602_v45 }
 0x13e   : > { %642 = vst [vmem:[#allocation2 + $0x20] sm:$0xff] %v610_v46 }
 0x13f   : > { %619 = vst [vmem:[#allocation2 + $0x48] sm:$0xff] %v587_v49 }
 0x140   : > { %627 = vst [vmem:[#allocation2 + $0x78] sm:$0xff] %v595_v50 }
 0x142   : > { %v557_v53 = vpop.f32.mrf.mxu2  ;;  %v577_v54 = vpop.f32.mrf.mxu3  ;;  %647 = sbr.rel (%p974_p1) target bundleno = 362 (0x16a), region = 48 }
 0x143   : > { %v603_v55 = vadd.f32 %v557_v53, %v306_v51  ;;  %v611_v56 = vadd.f32 %v577_v54, %v314_v52 }
 0x145   : > { %635 = vst [vmem:[#allocation2 + $0xc0] sm:$0xff] %v603_v55 }
 0x146   : > { %643 = vst [vmem:[#allocation2 + $0x98] sm:$0xff] %v611_v56 }
 0x147   : > { %v648_v57 = vld [vmem:[#allocation2 + $0xb0] sm:$0xff]  ;;  %v1548_v58 = vld [vmem:[%s1699_s24] ss:$0 sm:$0xff]  ;;  %v650_v60 = vld [vmem:[#allocation2 + $0xd8] sm:$0xff] }
 0x148   : > { %v649_v59 = vld [vmem:[#allocation2] sm:$0xff]  ;;  %v651_v61 = vld [vmem:[#allocation2 + $0x18] sm:$0xff]  ;;  %v684_v62 = vadd.f32 %v1548_v58, %v648_v57  ;;  %v686_v0 = vadd.f32 %v1548_v58, %v650_v60  ;;  %v652_v1 = vld [vmem:[#allocation2 + $0x50] sm:$0xff] }
 0x149   : > { %v685_v63 = vadd.f32 %v1548_v58, %v649_v59  ;;  %v653_v2 = vld [vmem:[#allocation2 + $0x68] sm:$0xff]  ;;  %v687_v3 = vadd.f32 %v1548_v58, %v651_v61  ;;  %v654_v4 = vld [vmem:[#allocation2 + $0x30] sm:$0xff]  ;;  %v688_v5 = vadd.f32 %v1548_v58, %v652_v1  ;;  %v656_v8 = vld [vmem:[#allocation2 + $0x80] sm:$0xff] }
 0x14a   : > { %716 = vst [vmem:[%s1514_s12] sm:$0xff] %v684_v62  ;;  %v655_v6 = vld [vmem:[#allocation2 + $0x48] sm:$0xff]  ;;  %v689_v7 = vadd.f32 %v1548_v58, %v653_v2  ;;  %v690_v9 = vadd.f32 %v1548_v58, %v654_v4  ;;  %v692_v13 = vadd.f32 %v1548_v58, %v656_v8  ;;  %v659_v14 = vld [vmem:[#allocation2 + $0xb8] sm:$0xff]  ;;  %v660_v16 = vld [vmem:[#allocation2 + $0x60] sm:$0xff] }
 0x14b   : > { %717 = vst [vmem:[%s1514_s12 + $0x8] sm:$0xff] %v685_v63  ;;  %v657_v10 = vld [vmem:[#allocation2 + $0x88] sm:$0xff]  ;;  %v691_v11 = vadd.f32 %v1548_v58, %v655_v6  ;;  %v661_v18 = vld [vmem:[#allocation2 + $0xf0] sm:$0xff]  ;;  %v695_v19 = vadd.f32 %v1548_v58, %v659_v14  ;;  %v696_v21 = vadd.f32 %v1548_v58, %v660_v16  ;;  %v663_v22 = vld [vmem:[#allocation2 + $0x78] sm:$0xff] }
 0x14c   : > { %718 = vst [vmem:[%s1514_s12 + $0x10] sm:$0xff] %v686_v0  ;;  %v658_v12 = vld [vmem:[#allocation2 + $0xe8] sm:$0xff]  ;;  %v693_v15 = vadd.f32 %v1548_v58, %v657_v10  ;;  %v697_v23 = vadd.f32 %v1548_v58, %v661_v18  ;;  %v664_v24 = vld [vmem:[#allocation2 + $0x38] sm:$0xff]  ;;  %v699_v27 = vadd.f32 %v1548_v58, %v663_v22  ;;  %v666_v28 = vld [vmem:[#allocation2 + $0x40] sm:$0xff] }
 0x14d   : > { %719 = vst [vmem:[%s1514_s12 + $0x18] sm:$0xff] %v687_v3  ;;  %v694_v17 = vadd.f32 %v1548_v58, %v658_v12  ;;  %v662_v20 = vld [vmem:[#allocation2 + $0x8] sm:$0xff]  ;;  %v665_v26 = vld [vmem:[#allocation2 + $0x58] sm:$0xff]  ;;  %v700_v29 = vadd.f32 %v1548_v58, %v664_v24  ;;  %v668_v32 = vld [vmem:[#allocation2 + $0xe0] sm:$0xff]  ;;  %v702_v33 = vadd.f32 %v1548_v58, %v666_v28 }
 0x14e   : > { %720 = vst [vmem:[%s1514_s12 + $0x20] sm:$0xff] %v688_v5  ;;  %v698_v25 = vadd.f32 %v1548_v58, %v662_v20  ;;  %v667_v30 = vld [vmem:[#allocation2 + $0xc8] sm:$0xff]  ;;  %v701_v31 = vadd.f32 %v1548_v58, %v665_v26  ;;  %v669_v34 = vld [vmem:[#allocation2 + $0x90] sm:$0xff]  ;;  %v704_v37 = vadd.f32 %v1548_v58, %v668_v32  ;;  %v671_v38 = vld [vmem:[#allocation2 + $0xc0] sm:$0xff] }
 0x14f   : > { %721 = vst [vmem:[%s1514_s12 + $0x28] sm:$0xff] %v689_v7  ;;  %v703_v35 = vadd.f32 %v1548_v58, %v667_v30  ;;  %v670_v36 = vld [vmem:[#allocation2 + $0x70] sm:$0xff]  ;;  %v705_v39 = vadd.f32 %v1548_v58, %v669_v34  ;;  %v672_v40 = vld [vmem:[#allocation2 + $0xa8] sm:$0xff]  ;;  %v707_v43 = vadd.f32 %v1548_v58, %v671_v38  ;;  %v676_v48 = vld [vmem:[#allocation2 + $0xa0] sm:$0xff] }
 0x150   : > { %722 = vst [vmem:[%s1514_s12 + $0x30] sm:$0xff] %v690_v9  ;;  %v706_v41 = vadd.f32 %v1548_v58, %v670_v36  ;;  %v673_v42 = vld [vmem:[#allocation2 + $0xd0] sm:$0xff]  ;;  %v708_v45 = vadd.f32 %v1548_v58, %v672_v40  ;;  %v675_v46 = vld [vmem:[#allocation2 + $0x28] sm:$0xff]  ;;  %v677_v50 = vld [vmem:[#allocation2 + $0xf8] sm:$0xff]  ;;  %v712_v53 = vadd.f32 %v1548_v58, %v676_v48 }
 0x151   : > { %723 = vst [vmem:[%s1514_s12 + $0x38] sm:$0xff] %v691_v11  ;;  %v674_v44 = vld [vmem:[#allocation2 + $0x10] sm:$0xff]  ;;  %v709_v47 = vadd.f32 %v1548_v58, %v673_v42  ;;  %v711_v51 = vadd.f32 %v1548_v58, %v675_v46  ;;  %v678_v52 = vld [vmem:[#allocation2 + $0x20] sm:$0xff]  ;;  %v679_v54 = vld [vmem:[#allocation2 + $0x98] sm:$0xff]  ;;  %v713_v55 = vadd.f32 %v1548_v58, %v677_v50 }
 0x152   : > { %724 = vst [vmem:[%s1514_s12 + $0x40] sm:$0xff] %v692_v13  ;;  %v710_v49 = vadd.f32 %v1548_v58, %v674_v44  ;;  %v714_v56 = vadd.f32 %v1548_v58, %v678_v52  ;;  %v715_v57 = vadd.f32 %v1548_v58, %v679_v54 }
 0x153   : > { %725 = vst [vmem:[%s1514_s12 + $0x48] sm:$0xff] %v693_v15 }
 0x154   : > { %726 = vst [vmem:[%s1514_s12 + $0x50] sm:$0xff] %v694_v17 }
 0x155   : > { %727 = vst [vmem:[%s1514_s12 + $0x58] sm:$0xff] %v695_v19 }
 0x156   : > { %728 = vst [vmem:[%s1514_s12 + $0x60] sm:$0xff] %v696_v21 }
 0x157   : > { %729 = vst [vmem:[%s1514_s12 + $0x68] sm:$0xff] %v697_v23 }
 0x158   : > { %730 = vst [vmem:[%s1514_s12 + $0x70] sm:$0xff] %v698_v25 }
 0x159   : > { %731 = vst [vmem:[%s1514_s12 + $0x78] sm:$0xff] %v699_v27 }
 0x15a   : > { %732 = vst [vmem:[%s1514_s12 + $0x80] sm:$0xff] %v700_v29 }
 0x15b   : > { %733 = vst [vmem:[%s1514_s12 + $0x88] sm:$0xff] %v701_v31 }
 0x15c   : > { %734 = vst [vmem:[%s1514_s12 + $0x90] sm:$0xff] %v702_v33 }
 0x15d   : > { %735 = vst [vmem:[%s1514_s12 + $0x98] sm:$0xff] %v703_v35 }
 0x15e   : > { %736 = vst [vmem:[%s1514_s12 + $0xa0] sm:$0xff] %v704_v37 }
 0x15f   : > { %737 = vst [vmem:[%s1514_s12 + $0xa8] sm:$0xff] %v705_v39 }
 0x160   : > { %738 = vst [vmem:[%s1514_s12 + $0xb0] sm:$0xff] %v706_v41 }
 0x161   : > { %739 = vst [vmem:[%s1514_s12 + $0xb8] sm:$0xff] %v707_v43 }
 0x162   : > { %740 = vst [vmem:[%s1514_s12 + $0xc0] sm:$0xff] %v708_v45 }
 0x163   : > { %741 = vst [vmem:[%s1514_s12 + $0xc8] sm:$0xff] %v709_v47 }
 0x164   : > { %742 = vst [vmem:[%s1514_s12 + $0xd0] sm:$0xff] %v710_v49 }
 0x165   : > { %743 = vst [vmem:[%s1514_s12 + $0xd8] sm:$0xff] %v711_v51 }
 0x166   : > { %744 = vst [vmem:[%s1514_s12 + $0xe0] sm:$0xff] %v712_v53 }
 0x167   : > { %745 = vst [vmem:[%s1514_s12 + $0xe8] sm:$0xff] %v713_v55 }
 0x168   : > { %746 = vst [vmem:[%s1514_s12 + $0xf0] sm:$0xff] %v714_v56 }
 0x169   : > { %747 = vst [vmem:[%s1514_s12 + $0xf8] sm:$0xff] %v715_v57 }
 0x16a PF: > { %s1700_s18 = sld [smem:[#allocation13_spill]]  ;;  %s761_s28 = sshll.u32 %s1514_s12, 4  ;;  %s762_s28 = int_to_ptr.vmem [resolvable:$true] %s761_s28 }
 0x16b   : > { %s1702_s7 = sld [smem:[#allocation20_spill]]  ;;  %s749_s10 = scalar_lea.sflag [#allocation5], %s221_s2 }
 0x170   : > { %s1004_s5 = sshll.u32 %s1700_s18, 8 }
 0x171   : > { %s760_s30 = scalar_lea.hbm %s1702_s7, %s1004_s5  ;;  %s1230_s27 = scalar_lea.hbm %s1702_s7, 512 }
 0x172   : > { %s763_s8 = sshll.u32 %s760_s30, 4  ;;  %s764_s8 = int_to_ptr.hbm [resolvable:$true] %s763_s8 }
 0x173   : > { %s1224_s19 = sshra.s32 %s764_s8, 4  ;;  %s1225_s19 = int_to_ptr.hbm [resolvable:$true] %s1224_s19 }
 0x174   : > { %s1226_s3 = scalar_lea.hbm %s1225_s19, 256  ;;  %p1231_p3 = scmp.lt.s32.totalorder %s1225_s19, %s1702_s7 }
 0x175   : > { %p1227_p4 = scmp.ne.s32.totalorder %s1225_s19, %s1226_s3  ;;  %p1232_p5 = scmp.lt.s32.totalorder %s1230_s27, %s1226_s3 }
 0x177   : > { %p1228_p0 = pnand %p1227_p4, %p1435_p6  ;;  %p1233_p7 = por %p1232_p5, %p1231_p3 }
 0x179   : > { %p1229_p2 = pneg %p1228_p0 }
 0x17b   : > { %p1234_p8 = pnand %p1233_p7, %p1229_p2 }
 0x17d   : > { %1237 = shalt.err (!%p1234_p8)
}
 0x17e   : > { %s1343_s2 = smov 128   ;;  %s1344_s12 = smov 8  }
 0x17f   : > { %1036 = dma.vmem_to_hbm [thread:$0]  (%p1435_p6), %s762_s28, 4096, %s764_s8, %s749_s10, %s1343_s2, %s1343_s2, %s1344_s12  }
 0x180 PF: > { %s1703_s15 = sld [smem:[#allocation12_spill]]  ;;  %p1053_p9 = scmp.ge.s32.totalorder %s1336_s22, 2 }
 0x182   : > { %p1047_p12 = pnand %p1053_p9, %p1441_p10 }
 0x184   : > { %p1048_p13 = pneg %p1047_p12 }
 0x186   : > { %s778_s18 = sand.u32 1, %s1703_s15  }
 0x187   : > { %s779_s5 = scalar_lea.sflag [#allocation5], %s778_s18 }
 0x188   : > { %1291 = dma.done.wait (%p1048_p13), %s779_s5, 4096  }
 0x189   : > { %1293 = vsyncadd (%p1048_p13), %s779_s5, 4294963200  ;;  %s20_s22 = sadd.s32 1, %s1336_s22   ;;  %s1705_s4 = sld [smem:[#allocation16_spill]] }
 0x18a   : > { %p17_p11 = scmp.ge.s32.totalorder %s20_s22, 8   ;;  %s1706_s23 = sld [smem:[#allocation17_spill]] }
 0x18b   : > { %s1707_s12 = smov %s1300_s13  ;;  %s1708_s13 = smov %s1304_s14 }
 0x18c   : > { %s1709_s14 = smov %s1483_s9  ;;  %s1710_s15 = smov %s1312_s16 }
 0x18d   : > { %s1711_s16 = smov %s1316_s17  ;;  %s1712_s17 = smov %s1486_s1 }
 0x18e   : > { %s1713_s18 = smov %s1328_s20  ;;  %s1714_s19 = smov %s1332_s21 }
 0x18f   : > { %s1715_s20 = smov %s1705_s4  ;;  %19 = sbr.rel (!%p17_p11) target bundleno = 14 (0xe), region = 90 }
 0x190   : > { %s1716_s21 = smov %s1706_s23 }
 0x194   :  { %785 = vsyncpa [#allocation4], 1 }
 0x195   :  { %787 = vsyncpa [#allocation4 + $0x1], 1 }
 0x196   :  { %788 = vsyncpa [#allocation7], 1 }
 0x197   :  { %789 = vsyncpa [#allocation5], 1 }
 0x198   :  { %791 = vsyncpa [#allocation5 + $0x1], 1 }

</bundles_post_ra>
